<compile_context>
chip_gen: v7x
topology: tpu7x:2x2x1
jax: 0.10.0
libtpu: 0.0.40
codegen_flags: <defaults>
</compile_context>

<pallas_src>
import functools

import jax
import jax.numpy as jnp
from jax.experimental import pallas as pl
from jax.experimental.pallas import tpu as pltpu


# ---------------------------------------------------------------------------
# Kernels
# ---------------------------------------------------------------------------
def _matmul_relu_f32out_kernel(a_ref, b_ref, o_ref, *, compute_dtype):
    """Tiled matmul accumulating directly into the f32 output block.

    The output BlockSpec ignores the K grid index, so o_ref stays resident in
    VMEM across the whole K reduction -> no separate accumulator scratch
    (saves tm*tn*4 B of VMEM and a full-tile copy + store at finalize).
    """
    k = pl.program_id(2)

    @pl.when(k == 0)
    def _():
        o_ref[...] = jnp.zeros_like(o_ref)

    a = a_ref[...]
    b = b_ref[...]
    if compute_dtype is not None and a.dtype != compute_dtype:
        # Per-tile cast inside the kernel: hidden under MXU work, unlike a
        # wrapper-side astype (which is an extra un-hidden HBM read+write).
        a = a.astype(compute_dtype)
        b = b.astype(compute_dtype)
    o_ref[...] += jnp.dot(a, b, preferred_element_type=jnp.float32)

    @pl.when(k == pl.num_programs(2) - 1)
    def _():
        o_ref[...] = jnp.maximum(o_ref[...], 0.0)


def _matmul_relu_acc_kernel(a_ref, b_ref, o_ref, acc_ref, *, compute_dtype):
    """Tiled matmul with f32 scratch accumulator (non-f32 output dtypes)."""
    k = pl.program_id(2)

    @pl.when(k == 0)
    def _():
        acc_ref[...] = jnp.zeros_like(acc_ref)

    a = a_ref[...]
    b = b_ref[...]
    if compute_dtype is not None and a.dtype != compute_dtype:
        a = a.astype(compute_dtype)
        b = b.astype(compute_dtype)
    acc_ref[...] += jnp.dot(a, b, preferred_element_type=jnp.float32)

    @pl.when(k == pl.num_programs(2) - 1)
    def _():
        o_ref[...] = jnp.maximum(acc_ref[...], 0.0).astype(o_ref.dtype)


def _gemv_relu_kernel(a_ref, v_ref, o_ref, acc_ref):
    """(M,K) @ (K,): per-row VPU multiply + XLU lane reduction (no MXU)."""
    k = pl.program_id(1)

    @pl.when(k == 0)
    def _():
        acc_ref[...] = jnp.zeros_like(acc_ref)

    prod = a_ref[...].astype(jnp.float32) * v_ref[...].astype(jnp.float32)
    acc_ref[...] += jnp.sum(prod, axis=-1, keepdims=True)

    @pl.when(k == pl.num_programs(1) - 1)
    def _():
        o_ref[...] = jnp.maximum(acc_ref[...], 0.0).astype(o_ref.dtype)


def _vecmat_relu_kernel(v_ref, b_ref, o_ref, acc_ref):
    """(K,) @ (K,N): VPU multiply + sublane reduction (no MXU)."""
    k = pl.program_id(1)

    @pl.when(k == 0)
    def _():
        acc_ref[...] = jnp.zeros_like(acc_ref)

    prod = b_ref[...].astype(jnp.float32) * v_ref[...].astype(jnp.float32)
    acc_ref[...] += jnp.sum(prod, axis=0, keepdims=True)

    @pl.when(k == pl.num_programs(1) - 1)
    def _():
        o_ref[...] = jnp.maximum(acc_ref[...], 0.0).astype(o_ref.dtype)


def _dot_relu_kernel(a_ref, b_ref, o_ref):
    """1-D x 1-D dot product + ReLU on the VPU/XLU (no MXU)."""
    prod = a_ref[...].astype(jnp.float32) * b_ref[...].astype(jnp.float32)
    s = jnp.sum(prod, axis=-1, keepdims=True)  # (1, 1)
    o_ref[...] = jnp.maximum(s, 0.0).astype(o_ref.dtype)


# ---------------------------------------------------------------------------
# Helpers
# ---------------------------------------------------------------------------
_VMEM_LIMIT = 48 * 1024 * 1024  # raises v5e's 16 MiB default, < v7x's 64 MiB


def _round_up(x, m):
    return ((x + m - 1) // m) * m


def _sublane_multiple(*dtypes):
    # f32 -> 8, bf16 -> 16, int8/fp8 -> 32 (second-to-last-dim packing).
    return max(8, *(32 // jnp.dtype(d).itemsize for d in dtypes))


def _split_k(k, align, max_tk):
    """Pick (kp, tk) with tk | kp, tk % align == 0, tk <= ~max_tk, kp >= k."""
    kp = _round_up(k, align)
    if kp <= max_tk:
        return kp, kp
    nks = pl.cdiv(kp, max_tk)
    tk = _round_up(pl.cdiv(kp, nks), align)
    return tk * nks, tk


# ---------------------------------------------------------------------------
# Pallas-call wrappers
# ---------------------------------------------------------------------------
@functools.partial(jax.jit, static_argnames=("out_dtype",))
def _dot_relu_1d(a, b, out_dtype):
    """relu(dot(a, b)) for two 1-D vectors -> scalar."""
    k = a.shape[0]
    kp = _round_up(max(k, 1), 128)
    a2 = jnp.pad(a, (0, kp - k))[None, :]
    b2 = jnp.pad(b, (0, kp - k))[None, :]

    out = pl.pallas_call(
        _dot_relu_kernel,
        out_shape=jax.ShapeDtypeStruct((1, 1), out_dtype),
        grid=(1,),
        in_specs=[
            pl.BlockSpec((1, kp), lambda i: (0, 0)),
            pl.BlockSpec((1, kp), lambda i: (0, 0)),
        ],
        out_specs=pl.BlockSpec((1, 1), lambda i: (0, 0)),
        compiler_params=pltpu.CompilerParams(
            dimension_semantics=("arbitrary",)
        ),
    )(a2, b2)
    return out[0, 0]


@functools.partial(jax.jit, static_argnames=("out_dtype",))
def _gemv_relu(a, v, out_dtype):
    """relu(A @ v): (M, K) x (K,) -> (M,) via VPU/XLU reduction."""
    m, k = a.shape
    sub = _sublane_multiple(a.dtype, v.dtype, out_dtype)

    kp, tk = _split_k(k, 128, 2048)
    tm = min(_round_up(m, sub), 512)

    a_p = a if kp == k else jnp.pad(a, ((0, 0), (0, kp - k)))
    v_p = (v if kp == k else jnp.pad(v, (0, kp - k)))[None, :]  # (1, kp)

    out = pl.pallas_call(
        _gemv_relu_kernel,
        out_shape=jax.ShapeDtypeStruct((m, 1), out_dtype),
        grid_spec=pltpu.PrefetchScalarGridSpec(
            num_scalar_prefetch=0,
            grid=(pl.cdiv(m, tm), kp // tk),
            in_specs=[
                pl.BlockSpec((tm, tk), lambda i, kk: (i, kk)),
                pl.BlockSpec((1, tk), lambda i, kk: (0, kk)),
            ],
            out_specs=pl.BlockSpec((tm, 1), lambda i, kk: (i, 0)),
            scratch_shapes=[pltpu.VMEM((tm, 1), jnp.float32)],
        ),
        compiler_params=pltpu.CompilerParams(
            dimension_semantics=("parallel", "arbitrary"),
            vmem_limit_bytes=_VMEM_LIMIT,
        ),
    )(a_p, v_p)
    return out[:, 0]


@functools.partial(jax.jit, static_argnames=("out_dtype",))
def _vecmat_relu(v, b, out_dtype):
    """relu(v @ B): (K,) x (K, N) -> (N,) via VPU + sublane reduction."""
    k, n = b.shape

    kp, tk = _split_k(k, 8, 1024)
    tn = min(_round_up(n, 128), 1024)

    b_p = b if kp == k else jnp.pad(b, ((0, kp - k), (0, 0)))
    v_p = (v if kp == k else jnp.pad(v, (0, kp - k)))[:, None]  # (kp, 1)

    out = pl.pallas_call(
        _vecmat_relu_kernel,
        out_shape=jax.ShapeDtypeStruct((1, n), out_dtype),
        grid_spec=pltpu.PrefetchScalarGridSpec(
            num_scalar_prefetch=0,
            grid=(pl.cdiv(n, tn), kp // tk),
            in_specs=[
                pl.BlockSpec((tk, 1), lambda j, kk: (kk, 0)),
                pl.BlockSpec((tk, tn), lambda j, kk: (kk, j)),
            ],
            out_specs=pl.BlockSpec((1, tn), lambda j, kk: (0, j)),
            scratch_shapes=[pltpu.VMEM((1, tn), jnp.float32)],
        ),
        compiler_params=pltpu.CompilerParams(
            dimension_semantics=("parallel", "arbitrary"),
            vmem_limit_bytes=_VMEM_LIMIT,
        ),
    )(v_p, b_p)
    return out[0]


@functools.partial(jax.jit, static_argnames=("out_dtype", "compute_dtype"))
def _matmul_relu_2d(a, b, out_dtype, compute_dtype):
    """relu(a @ b) for 2-D operands via a tiled, pipelined MXU kernel."""
    m, k = a.shape
    _, n = b.shape

    sub = _sublane_multiple(a.dtype, b.dtype, out_dtype)

    # Large lane-dense tiles: up to 512x512 output, K-step up to 1024.
    # f32 double-buffered working set: 2*(A 2 MiB + B 2 MiB + out 1 MiB)
    # ~= 10 MiB -> safe on v7x (64 MiB physical); vmem_limit raised for v5e.
    tm = min(_round_up(m, sub), 512)
    tn = min(_round_up(n, 128), 512)
    kp, tk = _split_k(k, 128, 1024)

    # v7x megacore: expose >= 2 parallel grid steps when possible so both
    # TensorCores get work (no-op on v5e/v6e and for already-large grids).
    if pl.cdiv(m, tm) * pl.cdiv(n, tn) < 2:
        if tn >= 256:
            tn = max(128, _round_up(tn // 2, 128))
        elif tm >= 2 * sub:
            tm = max(sub, _round_up(tm // 2, sub))

    # Zero-padding is correctness-critical along K only; M / N use cdiv grids
    # with masked partial edge tiles (no wrapper-side pad or output slice).
    a_p = a if kp == k else jnp.pad(a, ((0, 0), (0, kp - k)))
    b_p = b if kp == k else jnp.pad(b, ((0, kp - k), (0, 0)))

    grid = (pl.cdiv(m, tm), pl.cdiv(n, tn), kp // tk)  # K last (reduction)

    if jnp.dtype(out_dtype) == jnp.dtype(jnp.float32):
        kernel = functools.partial(
            _matmul_relu_f32out_kernel, compute_dtype=compute_dtype)
        scratch_shapes = []
    else:
        kernel = functools.partial(
            _matmul_relu_acc_kernel, compute_dtype=compute_dtype)
        scratch_shapes = [pltpu.VMEM((tm, tn), jnp.float32)]

    cost = pl.CostEstimate(
        flops=2 * m * n * kp,
        bytes_accessed=(a_p.size * a_p.dtype.itemsize
                        + b_p.size * b_p.dtype.itemsize
                        + m * n * jnp.dtype(out_dtype).itemsize),
        transcendentals=0,
    )

    return pl.pallas_call(
        kernel,
        out_shape=jax.ShapeDtypeStruct((m, n), out_dtype),
        grid_spec=pltpu.PrefetchScalarGridSpec(
            num_scalar_prefetch=0,
            grid=grid,
            in_specs=[
                pl.BlockSpec((tm, tk), lambda i, j, kk: (i, kk)),
                pl.BlockSpec((tk, tn), lambda i, j, kk: (kk, j)),
            ],
            out_specs=pl.BlockSpec((tm, tn), lambda i, j, kk: (i, j)),
            scratch_shapes=scratch_shapes,
        ),
        compiler_params=pltpu.CompilerParams(
            dimension_semantics=("parallel", "parallel", "arbitrary"),
            vmem_limit_bytes=_VMEM_LIMIT,
        ),
        cost_estimate=cost,
    )(a_p, b_p)


# ---------------------------------------------------------------------------
# Public wrapper: torch.matmul 1-D/2-D semantics + fused ReLU
# ---------------------------------------------------------------------------
def matmul_relu(m1, m2, use_bf16_mxu=False):
    """relu(matmul(m1, m2)) with torch.matmul 1-D / 2-D semantics.

    use_bf16_mxu=True feeds the MXU bf16 tiles (cast per-tile in-kernel, f32
    accumulation kept) — ~2x MXU throughput on v6e/v7x at a small accuracy
    cost. Default off to track the f32 reference closely.
    """
    a = jnp.asarray(m1)
    b = jnp.asarray(m2)
    out_dtype = jnp.promote_types(a.dtype, b.dtype)
    if not jnp.issubdtype(out_dtype, jnp.floating):
        # TODO(synk): exact integer matmul semantics are not implemented on
        # the MXU path (v7x has no integer MXU mode); guard instead of
        # silently computing in f32.
        raise NotImplementedError("matmul_relu supports floating dtypes only")
    a = a.astype(out_dtype)
    b = b.astype(out_dtype)

    # 1-D x 1-D: tiny VPU dot product (the exact PyTorch spec).
    if a.ndim == 1 and b.ndim == 1:
        assert a.shape[0] == b.shape[0], "inner dimensions must match"
        return _dot_relu_1d(a, b, out_dtype)

    # GEMV shapes: VPU/XLU reduction kernels (MXU tiles with N=1 / M=1 would
    # waste nearly the whole array).
    if a.ndim == 2 and b.ndim == 1:
        assert a.shape[1] == b.shape[0], "inner dimensions must match"
        return _gemv_relu(a, b, out_dtype)
    if a.ndim == 1 and b.ndim == 2:
        assert a.shape[0] == b.shape[0], "inner dimensions must match"
        return _vecmat_relu(a, b, out_dtype)

    assert a.ndim == 2 and b.ndim == 2, "only 1-D / 2-D operands supported"
    assert a.shape[1] == b.shape[0], "inner dimensions must match"

    compute_dtype = (
        jnp.bfloat16 if (use_bf16_mxu and a.dtype == jnp.float32) else None)
    return _matmul_relu_2d(a, b, out_dtype, compute_dtype)


if __name__ == "__main__":
    key = jax.random.PRNGKey(0)
    k1, k2, k3, k4 = jax.random.split(key, 4)

    # Case 1: exactly the PyTorch spec — two 1-D vectors of length 6
    # (torch.matmul(1-D, 1-D) is a dot product producing a scalar).
    v1 = jax.random.normal(k1, (6,), dtype=jnp.float32)
    v2 = jax.random.normal(k2, (6,), dtype=jnp.float32)
    out_vec = matmul_relu(v1, v2)
    jax.block_until_ready(out_vec)
    ref_vec = jnp.maximum(jnp.matmul(v1, v2), 0.0)
    assert out_vec.shape == ref_vec.shape
    assert jnp.allclose(out_vec, ref_vec, atol=1e-5, rtol=1e-5)

    # Case 2: small 2-D matmul (seq=8, hidden=32, out=16) through the tiled
    # MXU kernel (single masked (8,128) output tile, f32 accumulate-in-place).
    a = jax.random.normal(k3, (8, 32), dtype=jnp.float32)
    b = jax.random.normal(k4, (32, 16), dtype=jnp.float32)
    out_mat = matmul_relu(a, b)
    jax.block_until_ready(out_mat)
    ref_mat = jnp.maximum(jnp.matmul(a, b), 0.0)
    assert out_mat.shape == ref_mat.shape
    assert jnp.allclose(out_mat, ref_mat, atol=1e-4, rtol=1e-4)

    # Case 3: GEMV (2-D x 1-D) through the VPU/XLU reduction kernel.
    a2 = jax.random.normal(k3, (64, 48), dtype=jnp.float32)
    v3 = jax.random.normal(k4, (48,), dtype=jnp.float32)
    out_gemv = matmul_relu(a2, v3)
    jax.block_until_ready(out_gemv)
    ref_gemv = jnp.maximum(jnp.matmul(a2, v3), 0.0)
    assert out_gemv.shape == ref_gemv.shape
    assert jnp.allclose(out_gemv, ref_gemv, atol=1e-4, rtol=1e-4)

    # Case 4: 1-D x 2-D through the sublane-reduction kernel.
    v4 = jax.random.normal(k1, (48,), dtype=jnp.float32)
    b4 = jax.random.normal(k2, (48, 40), dtype=jnp.float32)
    out_vm = matmul_relu(v4, b4)
    jax.block_until_ready(out_vm)
    ref_vm = jnp.maximum(jnp.matmul(v4, b4), 0.0)
    assert out_vm.shape == ref_vm.shape
    assert jnp.allclose(out_vm, ref_vm, atol=1e-4, rtol=1e-4)

    # Case 5: exercises K-accumulation, partial N edge tile and the v7x
    # megacore split (grid = (1, 2, 2) with tm=256, tn=256, tk=640).
    a3 = jax.random.normal(k3, (256, 1280), dtype=jnp.float32)
    b3 = jax.random.normal(k4, (1280, 384), dtype=jnp.float32)
    out3 = matmul_relu(a3, b3)
    jax.block_until_ready(out3)
    ref3 = jnp.maximum(
        jnp.matmul(a3, b3, precision=jax.lax.Precision.HIGHEST), 0.0)
    assert out3.shape == ref3.shape
    assert jnp.allclose(out3, ref3, atol=1e-2, rtol=1e-2)

    print("KERNEL_OK")
</pallas_src>

<mosaic_0001>
module attributes {stable_mosaic.version = 11 : i64} {
  func.func @_dot_relu_kernel(%arg0: i32, %arg1: memref<1x128xf32, #tpu.memory_space<vmem>>, %arg2: memref<1x128xf32, #tpu.memory_space<vmem>>, %arg3: memref<1x1xf32, #tpu.memory_space<vmem>>) attributes {dimension_semantics = [#tpu.dimension_semantics<arbitrary>], iteration_bounds = array<i64: 1>, scalar_prefetch = 0 : i64, scratch_operands = 0 : i64, tpu.core_type = #tpu.core_type<tc>, window_params = [{pipeline_mode = #tpu.pipeline_mode<synchronous>, transform_indices = @transform_0, window_bounds = array<i64: 1, 128>}, {pipeline_mode = #tpu.pipeline_mode<synchronous>, transform_indices = @transform_1, window_bounds = array<i64: 1, 128>}, {pipeline_mode = #tpu.pipeline_mode<synchronous>, transform_indices = @transform_2, window_bounds = array<i64: 1, 1>}]} {
    %c0 = arith.constant 0 : index
    %c0_0 = arith.constant 0 : index
    %0 = vector.load %arg1[%c0, %c0_0] : memref<1x128xf32, #tpu.memory_space<vmem>>, vector<1x128xf32>
    %c0_1 = arith.constant 0 : index
    %c0_2 = arith.constant 0 : index
    %1 = vector.load %arg2[%c0_1, %c0_2] : memref<1x128xf32, #tpu.memory_space<vmem>>, vector<1x128xf32>
    %2 = arith.mulf %0, %1 : vector<1x128xf32>
    %cst = arith.constant dense<0.000000e+00> : vector<1xf32>
    %3 = vector.multi_reduction <add>, %2, %cst [1] : vector<1x128xf32> to vector<1xf32>
    %4 = vector.shape_cast %3 : vector<1xf32> to vector<1x1xf32>
    %cst_3 = arith.constant 0.000000e+00 : f32
    %5 = vector.broadcast %cst_3 : f32 to vector<1x1xf32>
    %6 = arith.maximumf %4, %5 : vector<1x1xf32>
    %c0_4 = arith.constant 0 : index
    %c0_5 = arith.constant 0 : index
    %7 = vector.load %arg3[%c0_4, %c0_5] : memref<1x1xf32, #tpu.memory_space<vmem>>, vector<1x1xf32>
    tpu.vector_store %arg3[%c0_4, %c0_5], %6 {strides = array<i32>} : memref<1x1xf32, #tpu.memory_space<vmem>>, vector<1x1xf32>,
    return
  }
  func.func @transform_0(%arg0: i32) -> (i32, i32) {
    %c0_i32 = arith.constant 0 : i32
    %c0_i32_0 = arith.constant 0 : i32
    %c0_i32_1 = arith.constant 0 : i32
    return %c0_i32, %c0_i32_0 : i32, i32
  }
  func.func @transform_1(%arg0: i32) -> (i32, i32) {
    %c0_i32 = arith.constant 0 : i32
    %c0_i32_0 = arith.constant 0 : i32
    %c0_i32_1 = arith.constant 0 : i32
    return %c0_i32, %c0_i32_0 : i32, i32
  }
  func.func @transform_2(%arg0: i32) -> (i32, i32) {
    %c0_i32 = arith.constant 0 : i32
    %c0_i32_0 = arith.constant 0 : i32
    %c0_i32_1 = arith.constant 0 : i32
    return %c0_i32, %c0_i32_0 : i32, i32
  }
}

</mosaic_0001>

<bundles_post_ra>
// kernel: _dot_relu_1d.1
= control target key start
LH: loop header
LB: loop body
LE: loop exit
PB: predicated region body
PF: predicated region fallthrough
CT: control target
= control target key end

     0   :  { %vm15_vm0 = vcmask 1040384   ;;  %s95_s0 = inlined_call_operand.vmem [shape: f32[1,128], index: 0, kind: input, shape index: {}]   ;;  %s96_s1 = inlined_call_operand.vmem [shape: f32[1,128], index: 1, kind: input, shape index: {}]   ;;  %s97_s2 = inlined_call_operand.hbm [shape: f32[1,1], index: 2, kind: output, shape index: {}]  }
   0x1   :  { %v12_v0 = vld [vmem:[%s95_s0] sm:$0x1] }
   0x2   :  { %v13_v1 = vld [vmem:[%s96_s1] sm:$0x1] }
   0x3   :  { %v14_v2 = vmul.f32 %v13_v1, %v12_v0 }
   0x4   :  { %7 = vsyncpa [#allocation3], 0  ;;  %s61_s13 = smov [#allocation2]   ;;  %vm20_vm1 = vcmask 0  }
   0x5   :  { %v16_v3 = vsel %vm15_vm0, %v14_v2, 0.0  ;;  %s28_s14 = sshll.u32 %s61_s13, 4  ;;  %s29_s14 = int_to_ptr.vmem [resolvable:$true] %s28_s14 }
   0x6   :  { %17 = vadd.xlane.f32.xlu0 %v16_v3  ;;  %s37_s15 = scalar_lea.vmem %s29_s14, 16  ;;  %s41_s16 = scalar_lea.vmem %s29_s14, 32 }
   0x7   :  { %p38_p0 = scmp.ne.s32.totalorder %s29_s14, %s37_s15  ;;  %p42_p1 = scmp.lt.s32.totalorder %s29_s14, %s29_s14 }
   0x8   :  { %p43_p2 = scmp.lt.s32.totalorder %s41_s16, %s37_s15 }
   0xa   :  { %p44_p3 = por %p43_p2, %p42_p1 }
   0xc   :  { %p45_p4 = pnand %p44_p3, %p38_p0 }
  0x93   :  { %v18_v4 = vpop.xlane.xlu0 %17 }
  0x94   :  { %v19_v5 = vmax.f32 %v18_v4, 0.0 }
  0x96   :  { %21 = vst.msk [vmem:[#allocation2] sm:$0x1] %vm20_vm1, %v19_v5 }
  0x97   :  { %48 = shalt.err (!%p45_p4)
}
  0x98   :  { %s49_s17 = scalar_lea.hbm %s97_s2, 16 }
  0x99   :  { %p50_p5 = scmp.ne.s32.totalorder %s97_s2, %s49_s17  ;;  %p53_p6 = scmp.lt.u32.totalorder %s49_s17, %s97_s2 }
  0x9b   :  { %p55_p7 = pnand %p53_p6, %p50_p5 }
  0x9d   :  { %58 = shalt.err (!%p55_p7)
}
  0x9e   :  { %31 = dma.vmem_to_hbm [thread:$0]  %s29_s14, 16, %s97_s2, [#allocation3]  }
  0x9f   :  { %59 = dma.done.wait [#allocation3], 16  }
  0xa0   :  { %60 = vsyncadd [#allocation3], 4294967280 }
  0xa1   :  { %35 = vsyncpa [#allocation3], 1 }

</bundles_post_ra>
